<compile_context>
chip_gen: v7x
topology: tpu7x:2x2x1
jax: 0.10.0
libtpu: 0.0.40
codegen_flags: <defaults>
</compile_context>

<pallas_src>
from functools import partial

import jax
import jax.numpy as jnp
from jax.experimental import pallas as pl
from jax.experimental.pallas import tpu as pltpu


def _round_up(x: int, m: int) -> int:
    return (x + m - 1) // m * m


def _pe_gather_kernel(pos_ref, pe_ref, out_ref, *, precision):
    # pos_ref: (tile, 1) int32            -- this tile's (wrapped/clamped) positions
    # pe_ref:  (k_chunk, channels_pad)    -- current chunk of the padded table
    # out_ref: (tile, channels_pad)       -- resident across the k axis (accumulator)
    k = pl.program_id(1)
    k_chunk = pe_ref.shape[0]
    tile = out_ref.shape[0]

    @pl.when(k == 0)
    def _():
        out_ref[...] = jnp.zeros_like(out_ref)

    pos = pos_ref[...]                                                   # (tile, 1)
    row_ids = (jax.lax.broadcasted_iota(jnp.int32, (tile, k_chunk), 1)
               + k * k_chunk)
    onehot = (row_ids == pos).astype(pe_ref.dtype)                       # (tile, k_chunk)

    # One-hot gather on the MXU. Exactly one (chunk, column) pair is nonzero
    # per output row, so accumulating into out_ref adds exact zeros otherwise.
    out_ref[...] += jnp.dot(
        onehot, pe_ref[...],
        precision=precision,
        preferred_element_type=jnp.float32,
    ).astype(out_ref.dtype)


def _positional_encoder_fwd(positions: jnp.ndarray, pe_padded: jnp.ndarray,
                            *, k_chunk: int, max_len: int, channels: int,
                            tile_n: int = 512) -> jnp.ndarray:
    """positions: (*) int -> (*, channels), gathered from the padded table."""
    max_len_pad, channels_pad = pe_padded.shape
    assert max_len_pad % k_chunk == 0
    num_k = max_len_pad // k_chunk
    out_dtype = pe_padded.dtype

    flat_pos = positions.reshape(-1).astype(jnp.int32)
    # torch-style negative indexing; too-large indices clamp instead of raising.
    flat_pos = jnp.where(flat_pos < 0, flat_pos + max_len, flat_pos)
    flat_pos = jnp.clip(flat_pos, 0, max_len - 1)                        # (N,)
    n = flat_pos.shape[0]

    # Output tiling: lane-dense, (8,128)-aligned.
    n_pad128 = _round_up(max(n, 1), 128)
    tile = min(tile_n, n_pad128)
    if tile == n_pad128 and n_pad128 >= 256:
        # Split into >= 2 parallel tiles so v7x's two TensorCores both get work.
        tile = _round_up(n_pad128 // 2, 128)
    n_pad = _round_up(max(n, 1), tile)
    num_tiles = n_pad // tile

    pos_col = jnp.pad(flat_pos, (0, n_pad - n)).reshape(n_pad, 1)        # (n_pad, 1)

    # Explicit VMEM budget: pe chunk + positions + output (double-buffered)
    # plus the materialized one-hot intermediate, with headroom.
    itemsize = jnp.dtype(out_dtype).itemsize
    vmem_bytes = (
        2 * k_chunk * channels_pad * itemsize      # pe chunk, double-buffered
        + 2 * tile * 128 * 4                       # positions block (lane-padded)
        + 2 * tile * channels_pad * itemsize       # output, double-buffered
        + 2 * tile * k_chunk * 4                   # one-hot + matmul intermediates
    )
    vmem_limit = min(max(2 * vmem_bytes + (1 << 20), 16 * 1024 * 1024),
                     60 * 1024 * 1024)             # stay under v7x's 64 MiB

    # f32 table -> exact gather (6-pass); bf16 table -> 1 MXU pass, exact in bf16.
    precision = (jax.lax.Precision.HIGHEST if out_dtype == jnp.float32
                 else jax.lax.Precision.DEFAULT)

    out_padded = pl.pallas_call(
        partial(_pe_gather_kernel, precision=precision),
        out_shape=jax.ShapeDtypeStruct((n_pad, channels_pad), out_dtype),
        grid_spec=pltpu.PrefetchScalarGridSpec(
            num_scalar_prefetch=0,
            grid=(num_tiles, num_k),
            in_specs=[
                # This tile's positions (revisited across k -> DMA'd once per tile).
                pl.BlockSpec((tile, 1), lambda i, k: (i, 0)),
                # k-th chunk of the padded table rows.
                pl.BlockSpec((k_chunk, channels_pad), lambda i, k: (k, 0)),
            ],
            out_specs=pl.BlockSpec((tile, channels_pad), lambda i, k: (i, 0)),
        ),
        compiler_params=pltpu.CompilerParams(
            dimension_semantics=("parallel", "arbitrary"),
            vmem_limit_bytes=vmem_limit,
        ),
    )(pos_col, pe_padded)

    return out_padded[:n, :channels].reshape(positions.shape + (channels,))


class PositionalEncoder:
    """JAX/Pallas port of tdgu.nn.utils.PositionalEncoder (forward = pe[positions])."""

    def __init__(self, channels: int, max_len: int,
                 min_timescale: float = 1.0, max_timescale: float = 10000.0,
                 dtype=jnp.float32) -> None:
        if channels % 2 != 0:
            # torch's .view(max_len, channels) fails for odd channels as well.
            raise ValueError("channels must be even")
        self.channels = channels
        self.max_len = max_len

        # Buffer init identical to the torch __init__ (f32).
        # NOTE: channels == 2 divides by zero here, exactly like the reference.
        position = jnp.arange(max_len, dtype=jnp.float32)[:, None]       # (max_len, 1)
        num_timescales = channels // 2
        log_timescale_increment = (
            jnp.log(jnp.float32(max_timescale) / jnp.float32(min_timescale))
            / (num_timescales - 1))
        inv_timescales = (
            min_timescale
            * jnp.exp(jnp.arange(num_timescales, dtype=jnp.float32)
                      * -log_timescale_increment)[None, :])              # (1, nt)
        scaled_time = position * inv_timescales                          # (max_len, nt)
        pe = jnp.concatenate(
            [jnp.sin(scaled_time), jnp.cos(scaled_time)], axis=1
        ).reshape(max_len, channels)
        self.pe = pe.astype(dtype)                                       # torch buffer analogue

        # Padding hoisted out of the per-call path: done once here.
        channels_pad = _round_up(channels, 128)
        k_chunk = min(512, _round_up(max_len, 128))
        max_len_pad = _round_up(max_len, k_chunk)
        self.k_chunk = k_chunk
        self.pe_padded = jnp.pad(
            self.pe,
            ((0, max_len_pad - max_len), (0, channels_pad - channels)))

    def __call__(self, positions: jnp.ndarray, *, tile_n: int = 512) -> jnp.ndarray:
        return _positional_encoder_fwd(
            positions, self.pe_padded,
            k_chunk=self.k_chunk, max_len=self.max_len,
            channels=self.channels, tile_n=tile_n)


if __name__ == "__main__":
    channels = 32
    max_len = 64

    enc = PositionalEncoder(channels, max_len)

    key = jax.random.PRNGKey(0)
    positions = jax.random.randint(key, (2, 8), 0, max_len, dtype=jnp.int32)

    out = enc(positions)
    out = jax.block_until_ready(out)

    # Reference check against a plain-JAX gather (the module's forward).
    ref = jnp.take(enc.pe, positions.reshape(-1), axis=0).reshape(
        positions.shape + (channels,))
    assert out.shape == positions.shape + (channels,)
    assert out.dtype == enc.pe.dtype
    assert jnp.allclose(out, ref, rtol=1e-6, atol=1e-6), \
        "Pallas gather mismatch vs reference"

    print("KERNEL_OK")
</pallas_src>

<mosaic_0001>
module attributes {stable_mosaic.version = 11 : i64} {
  func.func @_pe_gather_kernel(%arg0: i32, %arg1: i32, %arg2: memref<128x1xi32, #tpu.memory_space<vmem>>, %arg3: memref<128x128xf32, #tpu.memory_space<vmem>>, %arg4: memref<128x128xf32, #tpu.memory_space<vmem>>) attributes {dimension_semantics = [#tpu.dimension_semantics<parallel>, #tpu.dimension_semantics<arbitrary>], iteration_bounds = array<i64: 1, 1>, scalar_prefetch = 0 : i64, scratch_operands = 0 : i64, tpu.core_type = #tpu.core_type<tc>, window_params = [{transform_indices = @transform_0, window_bounds = array<i64: 128, 1>}, {transform_indices = @transform_1, window_bounds = array<i64: 128, 128>}, {transform_indices = @transform_2, window_bounds = array<i64: 128, 128>}]} {
    %c0_i32 = arith.constant 0 : i32
    %0 = arith.cmpi eq, %arg1, %c0_i32 : i32
    %1 = arith.extui %0 : i1 to i32
    %c0_i32_0 = arith.constant 0 : i32
    %2 = arith.cmpi ne, %1, %c0_i32_0 : i32
    scf.if %2 {
      %cst_8 = arith.constant 0.000000e+00 : f32
      %17 = vector.broadcast %cst_8 : f32 to vector<128x128xf32>
      %c0_9 = arith.constant 0 : index
      %c0_10 = arith.constant 0 : index
      %18 = vector.load %arg4[%c0_9, %c0_10] : memref<128x128xf32, #tpu.memory_space<vmem>>, vector<128x128xf32>
      tpu.vector_store %arg4[%c0_9, %c0_10], %17 {strides = array<i32>} : memref<128x128xf32, #tpu.memory_space<vmem>>, vector<128x128xf32>,
    } else {
    }
    %c0 = arith.constant 0 : index
    %c0_1 = arith.constant 0 : index
    %3 = vector.load %arg2[%c0, %c0_1] : memref<128x1xi32, #tpu.memory_space<vmem>>, vector<128x1xi32>
    %4 = tpu.iota {dimensions = array<i32: 1>} : vector<128x128xi32>
    %c128_i32 = arith.constant 128 : i32
    %5 = arith.muli %arg1, %c128_i32 : i32
    %6 = vector.broadcast %5 : i32 to vector<128x128xi32>
    %7 = arith.addi %4, %6 : vector<128x128xi32>
    %8 = vector.broadcast %3 : vector<128x1xi32> to vector<128x128xi32>
    %9 = arith.cmpi eq, %7, %8 : vector<128x128xi32>
    %10 = arith.extui %9 : vector<128x128xi1> to vector<128x128xi32>
    %11 = arith.sitofp %10 : vector<128x128xi32> to vector<128x128xf32>
    %c0_2 = arith.constant 0 : index
    %c0_3 = arith.constant 0 : index
    %12 = vector.load %arg4[%c0_2, %c0_3] : memref<128x128xf32, #tpu.memory_space<vmem>>, vector<128x128xf32>
    %c0_4 = arith.constant 0 : index
    %c0_5 = arith.constant 0 : index
    %13 = vector.load %arg3[%c0_4, %c0_5] : memref<128x128xf32, #tpu.memory_space<vmem>>, vector<128x128xf32>
    %cst = arith.constant dense<0.000000e+00> : vector<128x128xf32>
    %14 = tpu.matmul %11, %13, %cst {dimension_numbers = #tpu.dot_dimension_numbers<[1], [0], [0], [1], [0, 0, 1, 1], [], []>, precision = #tpu.contract_precision<fp32>} : vector<128x128xf32>, vector<128x128xf32>, vector<128x128xf32> -> vector<128x128xf32>
    %15 = arith.addf %12, %14 : vector<128x128xf32>
    %c0_6 = arith.constant 0 : index
    %c0_7 = arith.constant 0 : index
    %16 = vector.load %arg4[%c0_6, %c0_7] : memref<128x128xf32, #tpu.memory_space<vmem>>, vector<128x128xf32>
    tpu.vector_store %arg4[%c0_6, %c0_7], %15 {strides = array<i32>} : memref<128x128xf32, #tpu.memory_space<vmem>>, vector<128x128xf32>,
    return
  }
  func.func @transform_0(%arg0: i32, %arg1: i32) -> (i32, i32) {
    %c0_i32 = arith.constant 0 : i32
    %c0_i32_0 = arith.constant 0 : i32
    return %arg0, %c0_i32 : i32, i32
  }
  func.func @transform_1(%arg0: i32, %arg1: i32) -> (i32, i32) {
    %c0_i32 = arith.constant 0 : i32
    %c0_i32_0 = arith.constant 0 : i32
    return %arg1, %c0_i32 : i32, i32
  }
  func.func @transform_2(%arg0: i32, %arg1: i32) -> (i32, i32) {
    %c0_i32 = arith.constant 0 : i32
    %c0_i32_0 = arith.constant 0 : i32
    return %arg0, %c0_i32 : i32, i32
  }
}

</mosaic_0001>

<bundles_post_ra>
// kernel: tpu_custom_call.1
= control target key start
LH: loop header
LB: loop body
LE: loop exit
PB: predicated region body
PF: predicated region fallthrough
CT: control target
= control target key end

     0   :  { %v2411_v2 = vmov 0   ;;  %s3205_s0 = inlined_call_operand.vmem [shape: s32[128,1], index: 0, kind: input, shape index: {}]   ;;  %s3206_s1 = inlined_call_operand.vmem [shape: f32[128,128], index: 1, kind: input, shape index: {}]   ;;  %s3207_s2 = inlined_call_operand.hbm [shape: f32[128,128], index: 2, kind: output, shape index: {}]  }
   0x1   :  { %v34_v0 = vld [vmem:[%s3205_s0 + $0x10] sm:$0xff]  ;;  %v32_v1 = vld [vmem:[%s3205_s0] sm:$0xff]  ;;  %2386 = vset.pattern.permute.xlu1 %v2411_v2  ;;  %2385 = vset.pattern.permute.xlu0 %v2411_v2  ;;  %v35_v3 = vld [vmem:[%s3205_s0 + $0x18] sm:$0xff] }
   0x2   :  { %60 = vperm.xlu1 %2386, %v34_v0   ;;  %54 = vperm.xlu0 %2385, %v32_v1   ;;  %v33_v4 = vld [vmem:[%s3205_s0 + $0x8] sm:$0xff]  ;;  %v2447_v5 = vld [vmem:[%s3206_s1] sm:$0xff]  ;;  %v167_v9 = vld [vmem:[%s3206_s1 + $0x10] sm:$0xff] }
   0x3   :  { %v2452_v6 = vld [vmem:[%s3206_s1 + $0x8] sm:$0xff]  ;;  %v182_v7 = vand.u32 4294901760, %v2447_v5  ;;  %v168_v10 = vld [vmem:[%s3206_s1 + $0x18] sm:$0xff]  ;;  %v169_v11 = vld [vmem:[%s3206_s1 + $0x20] sm:$0xff]  ;;  %v188_v14 = vand.u32 4294901760, %v167_v9 }
   0x4   :  { %v185_v8 = vand.u32 4294901760, %v2452_v6  ;;  %v37_v12 = vld [vmem:[%s3205_s0 + $0x28] sm:$0xff]  ;;  %v36_v13 = vld [vmem:[%s3205_s0 + $0x20] sm:$0xff]  ;;  %v191_v15 = vand.u32 4294901760, %v168_v10  ;;  %v194_v19 = vand.u32 4294901760, %v169_v11  ;;  %v171_v21 = vld [vmem:[%s3206_s1 + $0x30] sm:$0xff] }
   0x5   :  { %v170_v16 = vld [vmem:[%s3206_s1 + $0x28] sm:$0xff]  ;;  %v172_v22 = vld [vmem:[%s3206_s1 + $0x38] sm:$0xff] }
   0x6   :  { %63 = vperm.xlu1 %2386, %v35_v3   ;;  %57 = vperm.xlu0 %2385, %v33_v4   ;;  %v2478_v17 = vpack.c.bf16 %v185_v8, %v182_v7  ;;  %v2480_v18 = vpack.c.bf16 %v191_v15, %v188_v14  ;;  %v197_v20 = vand.u32 4294901760, %v170_v16 }
   0xa   :  { %69 = vperm.xlu1 %2386, %v37_v12   ;;  %66 = vperm.xlu0 %2385, %v36_v13  }
   0xb   :  { %7 = vsyncpa [#allocation3], 0  ;;  %v39_v23 = vld [vmem:[%s3205_s0 + $0x38] sm:$0xff]  ;;  %v38_v24 = vld [vmem:[%s3205_s0 + $0x30] sm:$0xff]  ;;  %2204 = vmatprep.subr.bf16.mxu0 %v2478_v17  ;;  %2108 = vmatprep.subr.bf16.mxu1 %v2478_v17  ;;  %v2500_v25 = vpack.c.bf16 %v197_v20, %v194_v19  ;;  %v200_v26 = vand.u32 4294901760, %v171_v21  ;;  %v203_v27 = vand.u32 4294901760, %v172_v22  ;;  %v2513_v31 = vsub.f32 %v167_v9, %v188_v14 }
   0xc   :  { %2206 = vmatpush3.bf16.msra.mxu0 %v2478_v17  ;;  %2110 = vmatpush3.bf16.msra.mxu1 %v2478_v17  ;;  %v173_v28 = vld [vmem:[%s3206_s1 + $0x40] sm:$0xff]  ;;  %v174_v29 = vld [vmem:[%s3206_s1 + $0x48] sm:$0xff]  ;;  %v2511_v30 = vld [vmem:[%s3206_s1 + $0x50] sm:$0xff]  ;;  %v2518_v33 = vsub.f32 %v168_v10, %v191_v15  ;;  %v2534_v38 = vsub.f32 %v169_v11, %v194_v19  ;;  %v2536_v39 = vsub.f32 %v170_v16, %v197_v20 }
   0xd   :  { %2208 = vmatprep.subr.bf16.mxu0 %v2480_v18  ;;  %2112 = vmatprep.subr.bf16.mxu1 %v2480_v18  ;;  %v41_v32 = vld [vmem:[%s3205_s0 + $0x48] sm:$0xff]  ;;  %v40_v34 = vld [vmem:[%s3205_s0 + $0x40] sm:$0xff]  ;;  %v2526_v35 = vld [vmem:[%s3206_s1 + $0x58] sm:$0xff]  ;;  %v439_v37 = vand.u32 4294901760, %v2513_v31  ;;  %v206_v40 = vand.u32 4294901760, %v173_v28  ;;  %v209_v41 = vand.u32 4294901760, %v174_v29  ;;  %v2544_v44 = vpack.c.bf16 %v203_v27, %v200_v26 }
   0xe   :  { %75 = vperm.xlu1 %2386, %v39_v23   ;;  %72 = vperm.xlu0 %2385, %v38_v24   ;;  %v2531_v36 = vld [vmem:[%s3206_s1 + $0x60] sm:$0xff]  ;;  %v212_v42 = vand.u32 4294901760, %v2511_v30  ;;  %v446_v43 = vand.u32 4294901760, %v2518_v33  ;;  %v453_v46 = vand.u32 4294901760, %v2534_v38  ;;  %v460_v47 = vand.u32 4294901760, %v2536_v39  ;;  %v43_v52 = vld [vmem:[%s3205_s0 + $0x58] sm:$0xff] }
   0xf   :  { %v440_v45 = vsub.f32 %v2513_v31, %v439_v37  ;;  %v215_v48 = vand.u32 4294901760, %v2526_v35  ;;  %v218_v49 = vand.u32 4294901760, %v2531_v36  ;;  %v42_v53 = vld [vmem:[%s3205_s0 + $0x50] sm:$0xff]  ;;  %v2563_v54 = vld [vmem:[%s3206_s1 + $0x68] sm:$0xff]  ;;  %v2574_v59 = vsub.f32 %v2447_v5, %v182_v7  ;;  %v180_v20 = vld [vmem:[%s3206_s1 + $0x78] sm:$0xff] }
  0x10   :  { %2210 = vmatpush3.bf16.msra.mxu0 %v2480_v18  ;;  %2114 = vmatpush3.bf16.msra.mxu1 %v2480_v18  ;;  %v2551_v50 = vpack.c.bf16 %v446_v43, %v439_v37  ;;  %v447_v51 = vsub.f32 %v2518_v33, %v446_v43  ;;  %v2565_v56 = vpack.c.bf16 %v460_v47, %v453_v46  ;;  %v221_v3 = vand.u32 4294901760, %v2563_v54  ;;  %v45_v9 = vld [vmem:[%s3205_s0 + $0x68] sm:$0xff] }
  0x11   :  { %2212 = vmatprep.subr.bf16.mxu0 %v2500_v25  ;;  %2116 = vmatprep.subr.bf16.mxu1 %v2500_v25  ;;  %v441_v55 = vand.u32 4294901760, %v440_v45  ;;  %v454_v57 = vsub.f32 %v2534_v38, %v453_v46  ;;  %v461_v58 = vsub.f32 %v2536_v39, %v460_v47  ;;  %v2576_v61 = vsub.f32 %v171_v21, %v200_v26 }
  0x12   :  { %81 = vperm.xlu1 %2386, %v41_v32   ;;  %78 = vperm.xlu0 %2385, %v40_v34   ;;  %v448_v60 = vand.u32 4294901760, %v447_v51  ;;  %v2578_v62 = vsub.f32 %v172_v22, %v203_v27  ;;  %v2582_v63 = vpack.c.bf16 %v209_v41, %v206_v40  ;;  %v2587_v0 = vsub.f32 %v2452_v6, %v185_v8  ;;  %v44_v6 = vld [vmem:[%s3205_s0 + $0x60] sm:$0xff]  ;;  %v2603_v8 = vld [vmem:[%s3206_s1 + $0x70] sm:$0xff] }
  0x13   :  { %v455_v1 = vand.u32 4294901760, %v454_v57  ;;  %v462_v2 = vand.u32 4294901760, %v461_v58  ;;  %v467_v5 = vand.u32 4294901760, %v2576_v61  ;;  %v2607_v11 = vsub.f32 %v173_v28, %v206_v40  ;;  %v46_v32 = vld [vmem:[%s3205_s0 + $0x70] sm:$0xff] }
  0x14   :  { %2214 = vmatpush3.bf16.msra.mxu0 %v2500_v25  ;;  %2118 = vmatpush3.bf16.msra.mxu1 %v2500_v25  ;;  %v2590_v4 = vpack.c.bf16 %v448_v60, %v441_v55  ;;  %v474_v7 = vand.u32 4294901760, %v2578_v62  ;;  %v2609_v12 = vsub.f32 %v174_v29, %v209_v41  ;;  %v425_v13 = vand.u32 4294901760, %v2574_v59  ;;  %v47_v29 = vld [vmem:[%s3205_s0 + $0x78] sm:$0xff]  ;;  %s2414_s0 = smov [#allocation2]  }
  0x15   :  { %2216 = vmatprep.subr.bf16.mxu0 %v2544_v44  ;;  %2120 = vmatprep.subr.bf16.mxu1 %v2544_v44  ;;  %v2605_v10 = vpack.c.bf16 %v462_v2, %v455_v1  ;;  %v468_v15 = vsub.f32 %v2576_v61, %v467_v5  ;;  %v2624_v19 = vpack.c.bf16 %v215_v48, %v212_v42  ;;  %v432_v21 = vand.u32 4294901760, %v2587_v0  ;;  %s1504_s16 = sshll.u32 %s2414_s0, 4  ;;  %s1505_s16 = int_to_ptr.vmem [resolvable:$true] %s1504_s16 }
  0x16   :  { %87 = vperm.xlu1 %2386, %v43_v52   ;;  %84 = vperm.xlu0 %2385, %v42_v53   ;;  %v2614_v14 = vpack.c.bf16 %v474_v7, %v467_v5  ;;  %v475_v16 = vsub.f32 %v2578_v62, %v474_v7  ;;  %v481_v22 = vand.u32 4294901760, %v2607_v11  ;;  %v488_v23 = vand.u32 4294901760, %v2609_v12  ;;  %s2387_s17 = scalar_lea.vmem %s1505_s16, 2048  ;;  %p2392_p1 = scmp.lt.s32.totalorder %s1505_s16, %s1505_s16 }
  0x17   :  { %v2634_v24 = vpack.c.bf16 %v221_v3, %v218_v49  ;;  %v224_v26 = vand.u32 4294901760, %v2603_v8  ;;  %v469_v27 = vand.u32 4294901760, %v468_v15  ;;  %v2650_v41 = vsub.f32 %v2511_v30, %v212_v42  ;;  %p2388_p0 = scmp.ne.s32.totalorder %s1505_s16, %s2387_s17  ;;  %p2393_p2 = scmp.lt.s32.totalorder %s2387_s17, %s2387_s17 }
  0x18   :  { %2218 = vmatpush3.bf16.msra.mxu0 %v2544_v44  ;;  %2122 = vmatpush3.bf16.msra.mxu1 %v2544_v44  ;;  %v476_v28 = vand.u32 4294901760, %v475_v16  ;;  %v2643_v34 = vpack.c.bf16 %v488_v23, %v481_v22  ;;  %v482_v37 = vsub.f32 %v2607_v11, %v481_v22  ;;  %v489_v40 = vsub.f32 %v2609_v12, %v488_v23 }
  0x19   :  { %2220 = vmatprep.subr.bf16.mxu0 %v2582_v63  ;;  %2124 = vmatprep.subr.bf16.mxu1 %v2582_v63  ;;  %v227_v43 = vand.u32 4294901760, %v180_v20  ;;  %v426_v45 = vsub.f32 %v2574_v59, %v425_v13  ;;  %v501_v47 = vsub.f32 %v2526_v35, %v215_v48  ;;  %v433_v30 = vsub.f32 %v2587_v0, %v432_v21  ;;  %p2394_p3 = por %p2393_p2, %p2392_p1 }
  0x1a   :  { %93 = vperm.xlu1 %2386, %v45_v9   ;;  %90 = vperm.xlu0 %2385, %v44_v6   ;;  %v2655_v46 = vpack.c.bf16 %v476_v28, %v469_v27  ;;  %v483_v42 = vand.u32 4294901760, %v482_v37  ;;  %v490_v51 = vand.u32 4294901760, %v489_v40  ;;  %v495_v52 = vand.u32 4294901760, %v2650_v41 }
  0x1b   :  { %v502_v53 = vand.u32 4294901760, %v501_v47  ;;  %v508_v35 = vsub.f32 %v2531_v36, %v218_v49  ;;  %v515_v48 = vsub.f32 %v2563_v54, %v221_v3  ;;  %v2673_v58 = vpack.c.bf16 %v227_v43, %v224_v26  ;;  %p2395_p4 = pnand %p2394_p3, %p2388_p0 }
  0x1c   :  { %2222 = vmatpush3.bf16.msra.mxu0 %v2582_v63  ;;  %2126 = vmatpush3.bf16.msra.mxu1 %v2582_v63  ;;  %v2664_v55 = vpack.c.bf16 %v490_v51, %v483_v42  ;;  %v496_v57 = vsub.f32 %v2650_v41, %v495_v52  ;;  %v427_v60 = vand.u32 4294901760, %v426_v45  ;;  %v434_v5 = vand.u32 4294901760, %v433_v30 }
  0x1d   :  { %2224 = vmatprep.subr.bf16.mxu0 %v2624_v19  ;;  %2128 = vmatprep.subr.bf16.mxu1 %v2624_v19  ;;  %v2675_v1 = vpack.c.bf16 %v502_v53, %v495_v52  ;;  %v503_v2 = vsub.f32 %v501_v47, %v502_v53  ;;  %v509_v9 = vand.u32 4294901760, %v508_v35  ;;  %v516_v36 = vand.u32 4294901760, %v515_v48 }
  0x1e   :  { %99 = vperm.xlu1 %2386, %v47_v29   ;;  %96 = vperm.xlu0 %2385, %v46_v32   ;;  %v497_v7 = vand.u32 4294901760, %v496_v57  ;;  %v522_v15 = vsub.f32 %v2603_v8, %v224_v26  ;;  %v2684_v16 = vpack.c.bf16 %v432_v21, %v425_v13  ;;  %v529_v23 = vsub.f32 %v180_v20, %v227_v43 }
  0x1f   :  { %v504_v49 = vand.u32 4294901760, %v503_v2  ;;  %v2679_v54 = vpack.c.bf16 %v516_v36, %v509_v9  ;;  %v510_v3 = vsub.f32 %v508_v35, %v509_v9  ;;  %v517_v6 = vsub.f32 %v515_v48, %v516_v36 }
  0x20   :  { %2226 = vmatpush3.bf16.msra.mxu0 %v2624_v19  ;;  %2130 = vmatpush3.bf16.msra.mxu1 %v2624_v19  ;;  %v2690_v27 = vpack.c.bf16 %v434_v5, %v427_v60  ;;  %v523_v32 = vand.u32 4294901760, %v522_v15  ;;  %v530_v37 = vand.u32 4294901760, %v529_v23  ;;  %v2704_v45 = vpack.c.bf16 %v2587_v0, %v2574_v59 }
  0x21   :  { %2228 = vmatprep.subr.bf16.mxu0 %v2634_v24  ;;  %2132 = vmatprep.subr.bf16.mxu1 %v2634_v24  ;;  %v2686_v22 = vpack.c.bf16 %v504_v49, %v497_v7  ;;  %v511_v28 = vand.u32 4294901760, %v510_v3  ;;  %v518_v29 = vand.u32 4294901760, %v517_v6  ;;  %v2708_v30 = vpack.c.bf16 %v2518_v33, %v2513_v31 }
  0x22   :  { %v524_v26 = vsub.f32 %v522_v15, %v523_v32  ;;  %v2696_v13 = vpack.c.bf16 %v530_v37, %v523_v32  ;;  %v531_v20 = vsub.f32 %v529_v23, %v530_v37  ;;  %v2712_v42 = vpack.c.bf16 %v2536_v39, %v2534_v38 }
  0x23   :  { %v2692_v8 = vpack.c.bf16 %v518_v29, %v511_v28  ;;  %v2716_v51 = vpack.c.bf16 %v2578_v62, %v2576_v61  ;;  %v2720_v52 = vpack.c.bf16 %v2609_v12, %v2607_v11  ;;  %v2723_v53 = vpack.c.bf16 %v501_v47, %v2650_v41 }
  0x24   :  { %2230 = vmatpush3.bf16.msra.mxu0 %v2634_v24  ;;  %2134 = vmatpush3.bf16.msra.mxu1 %v2634_v24  ;;  %v525_v21 = vand.u32 4294901760, %v524_v26  ;;  %v532_v40 = vand.u32 4294901760, %v531_v20  ;;  %v2725_v59 = vpack.c.bf16 %v515_v48, %v508_v35  ;;  %v2727_v0 = vpack.c.bf16 %v529_v23, %v522_v15 }
  0x25   :  { %2232 = vmatprep.subr.bf16.mxu0 %v2673_v58  ;;  %2136 = vmatprep.subr.bf16.mxu1 %v2673_v58  ;;  %v48_v31 = vlaneseq  ;;  %v3208_v61 = vmov 0.0  }
  0x26   :  { %v2700_v43 = vpack.c.bf16 %v532_v40, %v525_v21 }
  0x27   :  { %v2729_v33 = vand.u32 127, %v48_v31 }
  0x28   :  { %2234 = vmatpush3.bf16.msra.mxu0 %v2673_v58  ;;  %2138 = vmatpush3.bf16.msra.mxu1 %v2673_v58 }
  0x29   :  { %2236 = vmatprep.subr.bf16.mxu0 %v2684_v16  ;;  %2140 = vmatprep.subr.bf16.mxu1 %v2690_v27 }
  0x81   :  { %v2731_v38 = vpop.permute.xlu1 %60  ;;  %v2733_v39 = vpop.permute.xlu0 %54 }
  0x82   :  { %vm103_vm0 = vcmp.eq.s32.totalorder %v2729_v33, %v2731_v38  ;;  %vm101_vm1 = vcmp.eq.s32.totalorder %v2729_v33, %v2733_v39 }
  0x83   :  { %v1517_v62 = vsel %vm103_vm0, 1.0, %v3208_v61  ;;  %v1515_v11 = vsel %vm101_vm1, 1.0, %v3208_v61 }
  0x84   :  { %v2747_v12 = vsub.f32 %v1517_v62, %v1517_v62  ;;  %v2749_v41 = vsub.f32 %v1515_v11, %v1515_v11 }
  0x85   :  { %v2751_v47 = vpop.permute.xlu1 %63  ;;  %v2753_v57 = vpop.permute.xlu0 %57 }
  0x86   :  { %vm104_vm2 = vcmp.eq.s32.totalorder %v2729_v33, %v2751_v47  ;;  %vm102_vm3 = vcmp.eq.s32.totalorder %v2729_v33, %v2753_v57  ;;  %v264_v35 = vand.u32 4294901760, %v2749_v41  ;;  %v284_v2 = vand.u32 4294901760, %v2747_v12 }
  0x87   :  { %v1518_v48 = vsel %vm104_vm2, 1.0, %v3208_v61  ;;  %v1516_v60 = vsel %vm102_vm3, 1.0, %v3208_v61 }
  0x88   :  { %v2769_v5 = vsub.f32 %v1518_v48, %v1518_v48  ;;  %v2771_v7 = vsub.f32 %v1516_v60, %v1516_v60  ;;  %1971 = vmatprep.mubr.f32.mxu0 %v264_v35  ;;  %v265_v9 = vsub.f32 %v2749_v41, %v264_v35  ;;  %v285_v29 = vsub.f32 %v2747_v12, %v284_v2 }
  0x89   :  { %v2774_v36 = vpop.permute.xlu1 %69  ;;  %v2776_v49 = vpop.permute.xlu0 %66 }
  0x8a   :  { %vm106_vm4 = vcmp.eq.s32.totalorder %v2729_v33, %v2774_v36  ;;  %vm105_vm5 = vcmp.eq.s32.totalorder %v2729_v33, %v2776_v49  ;;  %v266_v3 = vand.u32 4294901760, %v265_v9  ;;  %v274_v6 = vand.u32 4294901760, %v2771_v7 }
  0x8b   :  { %v1520_v15 = vsel %vm106_vm4, 1.0, %v3208_v61  ;;  %v1519_v23 = vsel %vm105_vm5, 1.0, %v3208_v61  ;;  %v294_v28 = vand.u32 4294901760, %v2769_v5  ;;  %v286_v35 = vand.u32 4294901760, %v285_v29 }
  0x8c   :  { %v2793_v32 = vsub.f32 %v1520_v15, %v1520_v15  ;;  %v2795_v37 = vsub.f32 %v1519_v23, %v1519_v23  ;;  %1803 = vmatprep.mubr.f32.mxu1 %v266_v3  ;;  %1972 = vmatmul.mubr.f32.vlgmr.msra.gmra.mrb[0].mxu0 %v274_v6  ;;  %v275_v26 = vsub.f32 %v2771_v7, %v274_v6 }
  0x8d   :  { %v2798_v20 = vpop.permute.xlu1 %75  ;;  %v2800_v21 = vpop.permute.xlu0 %72  ;;  %1974 = vmatprep.mubr.f32.mxu0 %v284_v2  ;;  %2238 = vmatpush3.bf16.msra.mxu0 %v2684_v16  ;;  %v295_v40 = vsub.f32 %v2769_v5, %v294_v28 }
  0x8e   :  { %vm108_vm6 = vcmp.eq.s32.totalorder %v2729_v33, %v2798_v20  ;;  %vm107_vm7 = vcmp.eq.s32.totalorder %v2729_v33, %v2800_v21  ;;  %v276_v31 = vand.u32 4294901760, %v275_v26  ;;  %2240 = vmatprep.subr.bf16.mxu0 %v2551_v50  ;;  %v304_v62 = vand.u32 4294901760, %v2795_v37 }
  0x8f   :  { %v1522_v11 = vsel %vm108_vm6, 1.0, %v3208_v61  ;;  %v1521_v16 = vsel %vm107_vm7, 1.0, %v3208_v61  ;;  %v314_v48 = vand.u32 4294901760, %v2793_v32  ;;  %v296_v15 = vand.u32 4294901760, %v295_v40 }
  0x90   :  { %v2819_v60 = vsub.f32 %v1522_v11, %v1522_v11  ;;  %v2821_v2 = vsub.f32 %v1521_v16, %v1521_v16  ;;  %1804 = vmatmul.mubr.f32.vlgmr.msra.gmra.mrb[0].mxu1 %v276_v31  ;;  %1975 = vmatmul.mubr.f32.gmra.mrb[2].mxu0 %v294_v28  ;;  %v305_v9 = vsub.f32 %v2795_v37, %v304_v62 }
  0x91   :  { %2142 = vmatpush3.bf16.msra.mxu1 %v2690_v27  ;;  %v2825_v3 = vpop.permute.xlu1 %81  ;;  %v2827_v6 = vpop.permute.xlu0 %78  ;;  %1806 = vmatprep.mubr.f32.mxu1 %v286_v35  ;;  %v315_v23 = vsub.f32 %v2793_v32, %v314_v48 }
  0x92   :  { %3215 = vst [vmem:[#allocation5_spill] sm:$0xff] %v2819_v60  ;;  %3216 = vst [vmem:[#allocation6_spill] sm:$0xff] %v2821_v2  ;;  %vm110_vm8 = vcmp.eq.s32.totalorder %v2729_v33, %v2825_v3  ;;  %vm109_vm9 = vcmp.eq.s32.totalorder %v2729_v33, %v2827_v6  ;;  %1977 = vmatprep.mubr.f32.mxu0 %v304_v62  ;;  %2242 = vmatpush3.bf16.msra.mxu0 %v2551_v50  ;;  %v306_v28 = vand.u32 4294901760, %v305_v9 }
  0x93   :  { %v324_v27 = vand.u32 4294901760, %v2821_v2  ;;  %v1524_v29 = vsel %vm110_vm8, 1.0, %v3208_v61  ;;  %v1523_v26 = vsel %vm109_vm9, 1.0, %v3208_v61  ;;  %2144 = vmatprep.subr.bf16.mxu1 %v2590_v4  ;;  %2244 = vmatprep.subr.bf16.mxu0 %v2565_v56  ;;  %v334_v40 = vand.u32 4294901760, %v2819_v60 }
  0x94   :  { %v2847_v50 = vsub.f32 %v1524_v29, %v1524_v29  ;;  %v2849_v31 = vsub.f32 %v1523_v26, %v1523_v26  ;;  %1807 = vmatmul.mubr.f32.gmra.mrb[2].mxu1 %v296_v15  ;;  %1978 = vmatmul.mubr.f32.gmra.mrb[4].mxu0 %v314_v48  ;;  %v316_v35 = vand.u32 4294901760, %v315_v23 }
  0x95   :  { %v325_v62 = vsub.f32 %v2821_v2, %v324_v27  ;;  %2146 = vmatpush3.bf16.msra.mxu1 %v2590_v4  ;;  %v2853_v11 = vpop.permute.xlu1 %87  ;;  %v2855_v16 = vpop.permute.xlu0 %84  ;;  %1809 = vmatprep.mubr.f32.mxu1 %v306_v28  ;;  %v335_v9 = vsub.f32 %v2819_v60, %v334_v40 }
  0x96   :  { %3217 = vst [vmem:[#allocation7_spill] sm:$0xff] %v2847_v50  ;;  %3218 = vst [vmem:[#allocation8_spill] sm:$0xff] %v2849_v31  ;;  %vm112_vm10 = vcmp.eq.s32.totalorder %v2729_v33, %v2853_v11  ;;  %vm111_vm11 = vcmp.eq.s32.totalorder %v2729_v33, %v2855_v16  ;;  %1980 = vmatprep.mubr.f32.mxu0 %v324_v27  ;;  %2246 = vmatpush3.bf16.msra.mxu0 %v2565_v56  ;;  %v344_v4 = vand.u32 4294901760, %v2849_v31 }
  0x97   :  { %v326_v48 = vand.u32 4294901760, %v325_v62  ;;  %v1526_v15 = vsel %vm112_vm10, 1.0, %v3208_v61  ;;  %v1525_v23 = vsel %vm111_vm11, 1.0, %v3208_v61  ;;  %2148 = vmatprep.subr.bf16.mxu1 %v2605_v10  ;;  %2248 = vmatprep.subr.bf16.mxu0 %v2614_v14  ;;  %v354_v28 = vand.u32 4294901760, %v2847_v50 }
  0x98   :  { %v2875_v56 = vsub.f32 %v1526_v15, %v1526_v15  ;;  %v2877_v27 = vsub.f32 %v1525_v23, %v1525_v23  ;;  %1810 = vmatmul.mubr.f32.gmra.mrb[4].mxu1 %v316_v35  ;;  %1981 = vmatmul.mubr.f32.gmra.mrb[6].mxu0 %v334_v40  ;;  %v345_v29 = vsub.f32 %v2849_v31, %v344_v4  ;;  %v336_v61 = vand.u32 4294901760, %v335_v9 }
  0x99   :  { %2150 = vmatpush3.bf16.msra.mxu1 %v2605_v10  ;;  %v2881_v26 = vpop.permute.xlu1 %93  ;;  %v2883_v62 = vpop.permute.xlu0 %90  ;;  %1812 = vmatprep.mubr.f32.mxu1 %v326_v48  ;;  %v355_v60 = vsub.f32 %v2847_v50, %v354_v28  ;;  %v3220_v35 = vmov 0.0  }
  0x9a   :  { %3219 = vst [vmem:[#allocation9_spill] sm:$0xff] %v2875_v56  ;;  %vm114_vm12 = vcmp.eq.s32.totalorder %v2729_v33, %v2881_v26  ;;  %vm113_vm13 = vcmp.eq.s32.totalorder %v2729_v33, %v2883_v62  ;;  %1983 = vmatprep.mubr.f32.mxu0 %v344_v4  ;;  %2250 = vmatpush3.bf16.msra.mxu0 %v2614_v14  ;;  %v346_v40 = vand.u32 4294901760, %v345_v29  ;;  %v364_v10 = vand.u32 4294901760, %v2877_v27 }
  0x9b   :  { %v1528_v48 = vsel %vm114_vm12, 1.0, %v3220_v35  ;;  %v1527_v9 = vsel %vm113_vm13, 1.0, %v3220_v35  ;;  %2152 = vmatprep.subr.bf16.mxu1 %v2655_v46  ;;  %2252 = vmatprep.subr.bf16.mxu0 %v2643_v34  ;;  %v374_v4 = vand.u32 4294901760, %v2875_v56  ;;  %v356_v31 = vand.u32 4294901760, %v355_v60 }
  0x9c   :  { %v2903_v14 = vsub.f32 %v1528_v48, %v1528_v48  ;;  %v2905_v15 = vsub.f32 %v1527_v9, %v1527_v9  ;;  %1813 = vmatmul.mubr.f32.gmra.mrb[6].mxu1 %v336_v61  ;;  %1984 = vmatmul.mubr.f32.gmra.mrb[8].mxu0 %v354_v28  ;;  %v365_v23 = vsub.f32 %v2877_v27, %v364_v10 }
  0x9d   :  { %2154 = vmatpush3.bf16.msra.mxu1 %v2655_v46  ;;  %v2909_v29 = vpop.permute.xlu1 %99  ;;  %v2911_v50 = vpop.permute.xlu0 %96  ;;  %1815 = vmatprep.mubr.f32.mxu1 %v346_v40  ;;  %v375_v2 = vsub.f32 %v2875_v56, %v374_v4 }
  0x9e   :  { %vm116_vm14 = vcmp.eq.s32.totalorder %v2729_v33, %v2909_v29  ;;  %vm115_vm15 = vcmp.eq.s32.totalorder %v2729_v33, %v2911_v50  ;;  %1986 = vmatprep.mubr.f32.mxu0 %v364_v10  ;;  %2254 = vmatpush3.bf16.msra.mxu0 %v2643_v34  ;;  %v366_v61 = vand.u32 4294901760, %v365_v23  ;;  %v384_v46 = vand.u32 4294901760, %v2905_v15 }
  0x9f   :  { %v1530_v28 = vsel %vm116_vm14, 1.0, %v3220_v35  ;;  %v1529_v60 = vsel %vm115_vm15, 1.0, %v3220_v35  ;;  %2156 = vmatprep.subr.bf16.mxu1 %v2664_v55  ;;  %2256 = vmatprep.subr.bf16.mxu0 %v2675_v1  ;;  %v394_v40 = vand.u32 4294901760, %v2903_v14  ;;  %v376_v9 = vand.u32 4294901760, %v375_v2 }
  0xa0   :  { %v2931_v34 = vsub.f32 %v1530_v28, %v1530_v28  ;;  %v2933_v10 = vsub.f32 %v1529_v60, %v1529_v60  ;;  %1816 = vmatmul.mubr.f32.gmra.mrb[8].mxu1 %v356_v31  ;;  %1987 = vmatmul.mubr.f32.gmra.mrb[10].mxu0 %v374_v4  ;;  %v385_v48 = vsub.f32 %v2905_v15, %v384_v46 }
  0xa1   :  { %2158 = vmatpush3.bf16.msra.mxu1 %v2664_v55  ;;  %1818 = vmatprep.mubr.f32.mxu1 %v366_v61  ;;  %v395_v56 = vsub.f32 %v2903_v14, %v394_v40 }
  0xa2   :  { %1989 = vmatprep.mubr.f32.mxu0 %v384_v46  ;;  %2258 = vmatpush3.bf16.msra.mxu0 %v2675_v1  ;;  %v386_v35 = vand.u32 4294901760, %v385_v48  ;;  %v404_v23 = vand.u32 4294901760, %v2933_v10  ;;  %v414_v28 = vand.u32 4294901760, %v2931_v34 }
  0xa3   :  { %2160 = vmatprep.subr.bf16.mxu1 %v2686_v22  ;;  %2260 = vmatprep.subr.bf16.mxu0 %v2679_v54  ;;  %v396_v1 = vand.u32 4294901760, %v395_v56 }
  0xa4   :  { %1819 = vmatmul.mubr.f32.gmra.mrb[10].mxu1 %v376_v9  ;;  %1990 = vmatmul.mubr.f32.gmra.mrb[12].mxu0 %v394_v40  ;;  %v405_v55 = vsub.f32 %v2933_v10, %v404_v23  ;;  %v415_v31 = vsub.f32 %v2931_v34, %v414_v28 }
  0xa5   :  { %2162 = vmatpush3.bf16.msra.mxu1 %v2686_v22  ;;  %1821 = vmatprep.mubr.f32.mxu1 %v386_v35  ;;  %v2413_v22 = vmov 1.0  }
  0xa6   :  { %1992 = vmatprep.mubr.f32.mxu0 %v404_v23  ;;  %2262 = vmatpush3.bf16.msra.mxu0 %v2679_v54  ;;  %v406_v2 = vand.u32 4294901760, %v405_v55  ;;  %v416_v54 = vand.u32 4294901760, %v415_v31 }
  0xa7   :  { %2164 = vmatprep.subr.bf16.mxu1 %v2692_v8  ;;  %2264 = vmatprep.subr.bf16.mxu0 %v2696_v13 }
  0xa8   :  { %1822 = vmatmul.mubr.f32.gmra.mrb[12].mxu1 %v396_v1  ;;  %1993 = vmatmul.mubr.f32.gmra.mrb[14].mxu0 %v414_v28 }
  0xa9   :  { %2166 = vmatpush3.bf16.msra.mxu1 %v2692_v8  ;;  %1824 = vmatprep.mubr.f32.mxu1 %v406_v2 }
  0xaa   :  { %2266 = vmatpush3.bf16.msra.mxu0 %v2696_v13  ;;  %2027 = vmatprep.mubr.msk.f32.mxu0 %vm101_vm1, %v2413_v22 }
  0xab   :  { %2168 = vmatprep.subr.bf16.mxu1 %v2700_v43  ;;  %2268 = vmatprep.subr.bf16.mxu0 %v2478_v17 }
  0xac   :  { %1825 = vmatmul.mubr.f32.gmra.mrb[14].mxu1 %v416_v54 }
  0xad   :  { %2170 = vmatpush3.bf16.msra.mxu1 %v2700_v43  ;;  %2028 = vmatmul.mubr.msk.f32.vlgmr.msra.gmra.mrb[0].mxu0 %vm102_vm3, %v2413_v22 }
  0xae   :  { %1859 = vmatprep.mubr.msk.f32.mxu1 %vm101_vm1, %v2413_v22  ;;  %2030 = vmatprep.mubr.msk.f32.mxu0 %vm103_vm0, %v2413_v22 }
  0xaf   :  { %2270 = vmatpush3.bf16.msra.mxu0 %v2478_v17  ;;  %2172 = vmatprep.subr.bf16.mxu1 %v2704_v45  ;;  %v3221_v17 = vld [vmem:[#allocation6_spill] sm:$0xff] }
  0xb0   :  { %1860 = vmatmul.mubr.msk.f32.vlgmr.msra.gmra.mrb[0].mxu1 %vm102_vm3, %v2413_v22  ;;  %2272 = vmatprep.subr.bf16.mxu0 %v2480_v18 }
  0xb1   :  { %2174 = vmatpush3.bf16.msra.mxu1 %v2704_v45  ;;  %2031 = vmatmul.mubr.msk.f32.gmra.mrb[2].mxu0 %vm104_vm2, %v2413_v22 }
  0xb2   :  { %1862 = vmatprep.mubr.msk.f32.mxu1 %vm103_vm0, %v2413_v22  ;;  %2033 = vmatprep.mubr.msk.f32.mxu0 %vm105_vm5, %v2413_v22 }
  0xb3   :  { %2274 = vmatpush3.bf16.msra.mxu0 %v2480_v18  ;;  %2176 = vmatprep.subr.bf16.mxu1 %v2708_v30  ;;  %v3222_v18 = vld [vmem:[#allocation5_spill] sm:$0xff] }
  0xb4   :  { %1863 = vmatmul.mubr.msk.f32.gmra.mrb[2].mxu1 %vm104_vm2, %v2413_v22  ;;  %2276 = vmatprep.subr.bf16.mxu0 %v2500_v25 }
  0xb5   :  { %2178 = vmatpush3.bf16.msra.mxu1 %v2708_v30  ;;  %2034 = vmatmul.mubr.msk.f32.gmra.mrb[4].mxu0 %vm106_vm4, %v2413_v22 }
  0xb6   :  { %1865 = vmatprep.mubr.msk.f32.mxu1 %vm105_vm5, %v2413_v22  ;;  %2036 = vmatprep.mubr.msk.f32.mxu0 %vm107_vm7, %v2413_v22 }
  0xb7   :  { %2278 = vmatpush3.bf16.msra.mxu0 %v2500_v25  ;;  %2180 = vmatprep.subr.bf16.mxu1 %v2712_v42  ;;  %v3223_v25 = vld [vmem:[#allocation8_spill] sm:$0xff] }
  0xb8   :  { %1866 = vmatmul.mubr.msk.f32.gmra.mrb[4].mxu1 %vm106_vm4, %v2413_v22  ;;  %2280 = vmatprep.subr.bf16.mxu0 %v2544_v44 }
  0xb9   :  { %2182 = vmatpush3.bf16.msra.mxu1 %v2712_v42  ;;  %2037 = vmatmul.mubr.msk.f32.gmra.mrb[6].mxu0 %vm108_vm6, %v2413_v22 }
  0xba   :  { %1868 = vmatprep.mubr.msk.f32.mxu1 %vm107_vm7, %v2413_v22  ;;  %2039 = vmatprep.mubr.msk.f32.mxu0 %vm109_vm9, %v2413_v22 }
  0xbb   :  { %2282 = vmatpush3.bf16.msra.mxu0 %v2544_v44  ;;  %2184 = vmatprep.subr.bf16.mxu1 %v2716_v51  ;;  %v3224_v44 = vld [vmem:[#allocation7_spill] sm:$0xff] }
  0xbc   :  { %1869 = vmatmul.mubr.msk.f32.gmra.mrb[6].mxu1 %vm108_vm6, %v2413_v22  ;;  %2284 = vmatprep.subr.bf16.mxu0 %v2582_v63 }
  0xbd   :  { %2186 = vmatpush3.bf16.msra.mxu1 %v2716_v51  ;;  %2040 = vmatmul.mubr.msk.f32.gmra.mrb[8].mxu0 %vm110_vm8, %v2413_v22 }
  0xbe   :  { %1871 = vmatprep.mubr.msk.f32.mxu1 %vm109_vm9, %v2413_v22  ;;  %2042 = vmatprep.mubr.msk.f32.mxu0 %vm111_vm11, %v2413_v22 }
  0xbf   :  { %2286 = vmatpush3.bf16.msra.mxu0 %v2582_v63  ;;  %2188 = vmatprep.subr.bf16.mxu1 %v2720_v52  ;;  %v3225_v63 = vld [vmem:[#allocation9_spill] sm:$0xff] }
  0xc0   :  { %1872 = vmatmul.mubr.msk.f32.gmra.mrb[8].mxu1 %vm110_vm8, %v2413_v22  ;;  %2288 = vmatprep.subr.bf16.mxu0 %v2624_v19 }
  0xc1   :  { %2190 = vmatpush3.bf16.msra.mxu1 %v2720_v52  ;;  %2043 = vmatmul.mubr.msk.f32.gmra.mrb[10].mxu0 %vm112_vm10, %v2413_v22 }
  0xc2   :  { %1874 = vmatprep.mubr.msk.f32.mxu1 %vm111_vm11, %v2413_v22  ;;  %2045 = vmatprep.mubr.msk.f32.mxu0 %vm113_vm13, %v2413_v22 }
  0xc3   :  { %2290 = vmatpush3.bf16.msra.mxu0 %v2624_v19  ;;  %2192 = vmatprep.subr.bf16.mxu1 %v2723_v53 }
  0xc4   :  { %1875 = vmatmul.mubr.msk.f32.gmra.mrb[10].mxu1 %vm112_vm10, %v2413_v22  ;;  %2292 = vmatprep.subr.bf16.mxu0 %v2634_v24 }
  0xc5   :  { %2194 = vmatpush3.bf16.msra.mxu1 %v2723_v53  ;;  %2046 = vmatmul.mubr.msk.f32.gmra.mrb[12].mxu0 %vm114_vm12, %v2413_v22 }
  0xc6   :  { %1877 = vmatprep.mubr.msk.f32.mxu1 %vm113_vm13, %v2413_v22  ;;  %2048 = vmatprep.mubr.msk.f32.mxu0 %vm115_vm15, %v2413_v22 }
  0xc7   :  { %2294 = vmatpush3.bf16.msra.mxu0 %v2634_v24  ;;  %2196 = vmatprep.subr.bf16.mxu1 %v2725_v59 }
  0xc8   :  { %1878 = vmatmul.mubr.msk.f32.gmra.mrb[12].mxu1 %vm114_vm12, %v2413_v22  ;;  %2296 = vmatprep.subr.bf16.mxu0 %v2673_v58 }
  0xc9   :  { %2198 = vmatpush3.bf16.msra.mxu1 %v2725_v59  ;;  %2049 = vmatmul.mubr.msk.f32.gmra.mrb[14].mxu0 %vm116_vm14, %v2413_v22 }
  0xca   :  { %1880 = vmatprep.mubr.msk.f32.mxu1 %vm115_vm15, %v2413_v22  ;;  %2083 = vmatprep.mubr.msk.f32.mxu0 %vm101_vm1, %v2413_v22 }
  0xcb   :  { %2298 = vmatpush3.bf16.msra.mxu0 %v2673_v58  ;;  %2200 = vmatprep.subr.bf16.mxu1 %v2727_v0 }
  0xcc   :  { %1881 = vmatmul.mubr.msk.f32.gmra.mrb[14].mxu1 %vm116_vm14, %v2413_v22 }
  0xcd   :  { %2202 = vmatpush3.bf16.msra.mxu1 %v2727_v0  ;;  %1915 = vmatprep.mubr.f32.mxu1 %v2749_v41 }
  0xce   :  { %2084 = vmatmul.mubr.msk.f32.vlgmr.msra.gmra.mrb[0].mxu0 %vm102_vm3, %v2413_v22 }
  0xcf   :  { %2086 = vmatprep.mubr.msk.f32.mxu0 %vm103_vm0, %v2413_v22 }
  0xd0   :  { %1916 = vmatmul.mubr.f32.vlgmr.msra.gmra.mrb[0].mxu1 %v2771_v7 }
  0xd1   :  { %1918 = vmatprep.mubr.f32.mxu1 %v2747_v12 }
  0xd2   :  { %2087 = vmatmul.mubr.msk.f32.gmra.mrb[2].mxu0 %vm104_vm2, %v2413_v22 }
  0xd3   :  { %2089 = vmatprep.mubr.msk.f32.mxu0 %vm105_vm5, %v2413_v22 }
  0xd4   :  { %1919 = vmatmul.mubr.f32.gmra.mrb[2].mxu1 %v2769_v5 }
  0xd5   :  { %1921 = vmatprep.mubr.f32.mxu1 %v2795_v37 }
  0xd6   :  { %2090 = vmatmul.mubr.msk.f32.gmra.mrb[4].mxu0 %vm106_vm4, %v2413_v22 }
  0xd7   :  { %2092 = vmatprep.mubr.msk.f32.mxu0 %vm107_vm7, %v2413_v22 }
  0xd8   :  { %1922 = vmatmul.mubr.f32.gmra.mrb[4].mxu1 %v2793_v32 }
  0xd9   :  { %1924 = vmatprep.mubr.f32.mxu1 %v3221_v17 }
  0xda   :  { %2093 = vmatmul.mubr.msk.f32.gmra.mrb[6].mxu0 %vm108_vm6, %v2413_v22 }
  0xdb   :  { %2095 = vmatprep.mubr.msk.f32.mxu0 %vm109_vm9, %v2413_v22 }
  0xdc   :  { %1925 = vmatmul.mubr.f32.gmra.mrb[6].mxu1 %v3222_v18 }
  0xdd   :  { %1927 = vmatprep.mubr.f32.mxu1 %v3223_v25 }
  0xde   :  { %2096 = vmatmul.mubr.msk.f32.gmra.mrb[8].mxu0 %vm110_vm8, %v2413_v22 }
  0xdf   :  { %2098 = vmatprep.mubr.msk.f32.mxu0 %vm111_vm11, %v2413_v22 }
  0xe0   :  { %1928 = vmatmul.mubr.f32.gmra.mrb[8].mxu1 %v3224_v44 }
  0xe1   :  { %1930 = vmatprep.mubr.f32.mxu1 %v2877_v27 }
  0xe2   :  { %2099 = vmatmul.mubr.msk.f32.gmra.mrb[10].mxu0 %vm112_vm10, %v2413_v22 }
  0xe3   :  { %2101 = vmatprep.mubr.msk.f32.mxu0 %vm113_vm13, %v2413_v22 }
  0xe4   :  { %1931 = vmatmul.mubr.f32.gmra.mrb[10].mxu1 %v3225_v63 }
  0xe5   :  { %1933 = vmatprep.mubr.f32.mxu1 %v2905_v15 }
  0xe6   :  { %2102 = vmatmul.mubr.msk.f32.gmra.mrb[12].mxu0 %vm114_vm12, %v2413_v22 }
  0xe7   :  { %2104 = vmatprep.mubr.msk.f32.mxu0 %vm115_vm15, %v2413_v22 }
  0xe8   :  { %1934 = vmatmul.mubr.f32.gmra.mrb[12].mxu1 %v2903_v14 }
  0xe9   :  { %1936 = vmatprep.mubr.f32.mxu1 %v2933_v10 }
  0xea   :  { %2105 = vmatmul.mubr.msk.f32.gmra.mrb[14].mxu0 %vm116_vm14, %v2413_v22 }
  0xec   :  { %1937 = vmatmul.mubr.f32.gmra.mrb[14].mxu1 %v2931_v34 }
 0x1a1   :  { %v2085_v19 = vpop.f32.mrb[0].mxu0 }
 0x1a2   :  { %v1373_v24 = vpop.f32.mrb[1].mxu0 }
 0x1a3   :  { %v1917_v58 = vpop.f32.mrb[0].mxu1 }
 0x1a4   :  { %v2299_v8 = vadd.f32 %v2085_v19, %v1917_v58  ;;  %v763_v13 = vpop.f32.mrb[1].mxu1 }
 0x1a5   :  { %v2088_v43 = vpop.f32.mrb[2].mxu0  ;;  %v2300_v45 = vadd.f32 %v1373_v24, %v763_v13 }
 0x1a6   :  { %v1385_v30 = vpop.f32.mrb[3].mxu0  ;;  %1484 = vst [vmem:[#allocation2 + $0x8] sm:$0xff] %v2299_v8 }
 0x1a7   :  { %v1920_v42 = vpop.f32.mrb[2].mxu1  ;;  %1483 = vst [vmem:[#allocation2] sm:$0xff] %v2300_v45 }
 0x1a8   :  { %v2301_v51 = vadd.f32 %v2088_v43, %v1920_v42  ;;  %v777_v52 = vpop.f32.mrb[3].mxu1 }
 0x1a9   :  { %v2091_v53 = vpop.f32.mrb[4].mxu0  ;;  %v2302_v59 = vadd.f32 %v1385_v30, %v777_v52 }
 0x1aa   :  { %v1397_v0 = vpop.f32.mrb[5].mxu0  ;;  %1486 = vst [vmem:[#allocation2 + $0x18] sm:$0xff] %v2301_v51 }
 0x1ab   :  { %v1923_v33 = vpop.f32.mrb[4].mxu1  ;;  %1485 = vst [vmem:[#allocation2 + $0x10] sm:$0xff] %v2302_v59 }
 0x1ac   :  { %v2303_v38 = vadd.f32 %v2091_v53, %v1923_v33  ;;  %v791_v39 = vpop.f32.mrb[5].mxu1 }
 0x1ad   :  { %v2094_v12 = vpop.f32.mrb[6].mxu0  ;;  %v2304_v41 = vadd.f32 %v1397_v0, %v791_v39 }
 0x1ae   :  { %v1409_v47 = vpop.f32.mrb[7].mxu0  ;;  %1488 = vst [vmem:[#allocation2 + $0x28] sm:$0xff] %v2303_v38 }
 0x1af   :  { %v1926_v57 = vpop.f32.mrb[6].mxu1  ;;  %1487 = vst [vmem:[#allocation2 + $0x20] sm:$0xff] %v2304_v41 }
 0x1b0   :  { %v2305_v5 = vadd.f32 %v2094_v12, %v1926_v57  ;;  %v805_v7 = vpop.f32.mrb[7].mxu1 }
 0x1b1   :  { %v2097_v36 = vpop.f32.mrb[8].mxu0  ;;  %v2306_v49 = vadd.f32 %v1409_v47, %v805_v7 }
 0x1b2   :  { %v1421_v32 = vpop.f32.mrb[9].mxu0  ;;  %1490 = vst [vmem:[#allocation2 + $0x38] sm:$0xff] %v2305_v5 }
 0x1b3   :  { %v1929_v37 = vpop.f32.mrb[8].mxu1  ;;  %1489 = vst [vmem:[#allocation2 + $0x30] sm:$0xff] %v2306_v49 }
 0x1b4   :  { %v2307_v20 = vadd.f32 %v2097_v36, %v1929_v37  ;;  %v819_v21 = vpop.f32.mrb[9].mxu1 }
 0x1b5   :  { %v2100_v3 = vpop.f32.mrb[10].mxu0  ;;  %v2308_v6 = vadd.f32 %v1421_v32, %v819_v21 }
 0x1b6   :  { %v1433_v50 = vpop.f32.mrb[11].mxu0  ;;  %1492 = vst [vmem:[#allocation2 + $0x48] sm:$0xff] %v2307_v20 }
 0x1b7   :  { %v1932_v11 = vpop.f32.mrb[10].mxu1  ;;  %1491 = vst [vmem:[#allocation2 + $0x40] sm:$0xff] %v2308_v6 }
 0x1b8   :  { %v2309_v16 = vadd.f32 %v2100_v3, %v1932_v11  ;;  %v833_v56 = vpop.f32.mrb[11].mxu1 }
 0x1b9   :  { %v2103_v27 = vpop.f32.mrb[12].mxu0  ;;  %v2310_v26 = vadd.f32 %v1433_v50, %v833_v56 }
 0x1ba   :  { %v1445_v62 = vpop.f32.mrb[13].mxu0  ;;  %1494 = vst [vmem:[#allocation2 + $0x58] sm:$0xff] %v2309_v16 }
 0x1bb   :  { %v1935_v4 = vpop.f32.mrb[12].mxu1  ;;  %1493 = vst [vmem:[#allocation2 + $0x50] sm:$0xff] %v2310_v26 }
 0x1bc   :  { %v2311_v14 = vadd.f32 %v2103_v27, %v1935_v4  ;;  %v847_v15 = vpop.f32.mrb[13].mxu1 }
 0x1bd   :  { %v2106_v29 = vpop.f32.mrb[14].mxu0  ;;  %v2312_v61 = vadd.f32 %v1445_v62, %v847_v15 }
 0x1be   :  { %v1457_v46 = vpop.f32.mrb[15].mxu0  ;;  %1496 = vst [vmem:[#allocation2 + $0x68] sm:$0xff] %v2311_v14 }
 0x1bf   :  { %v1938_v60 = vpop.f32.mrb[14].mxu1  ;;  %1495 = vst [vmem:[#allocation2 + $0x60] sm:$0xff] %v2312_v61 }
 0x1c0   :  { %v2313_v40 = vadd.f32 %v2106_v29, %v1938_v60  ;;  %v861_v34 = vpop.f32.mrb[15].mxu1 }
 0x1c1   :  { %v2314_v10 = vadd.f32 %v1457_v46, %v861_v34 }
 0x1c2   :  { %1498 = vst [vmem:[#allocation2 + $0x78] sm:$0xff] %v2313_v40 }
 0x1c3   :  { %1497 = vst [vmem:[#allocation2 + $0x70] sm:$0xff] %v2314_v10 }
 0x1c4   :  { %2398 = shalt.err (!%p2395_p4)
}
 0x1c5   :  { %s2399_s20 = scalar_lea.hbm %s3207_s2, 2048 }
 0x1c6   :  { %p2400_p5 = scmp.ne.s32.totalorder %s3207_s2, %s2399_s20  ;;  %p2403_p6 = scmp.lt.u32.totalorder %s2399_s20, %s3207_s2 }
 0x1c8   :  { %p2405_p7 = pnand %p2403_p6, %p2400_p5 }
 0x1ca   :  { %2408 = shalt.err (!%p2405_p7)
}
 0x1cb   :  { %s2415_s25 = smov 128   ;;  %s2416_s26 = smov 8  }
 0x1cc   :  { %1510 = dma.vmem_to_hbm [thread:$0]  %s1505_s16, 2048, %s3207_s2, [#allocation3], %s2415_s25, %s2415_s25, %s2416_s26  }
 0x1cd   :  { %2409 = dma.done.wait [#allocation3], 2048  }
 0x1ce   :  { %2410 = vsyncadd [#allocation3], 4294965248 }
 0x1cf   :  { %1514 = vsyncpa [#allocation3], 1 }

</bundles_post_ra>
